<compile_context>
chip_gen: v5e
topology: v5e:2x2
jax: 0.10.0
libtpu: 0.0.40
codegen_flags: <defaults>
</compile_context>

<pallas_src>
import functools

import jax
import jax.numpy as jnp
import numpy as np
from jax.experimental import pallas as pl
from jax.experimental.pallas import tpu as pltpu


def gated_cross_attn_kernel(x_ref, wg1T_ref, consts_ref, out_ref, *, matmul_dtype):
    """One (batch, seq-tile) grid step.

    x_ref:      (1, s_tile, D)  speech rows for this batch / seq tile
    wg1T_ref:   (D, D)          gate_linear.weight[:, :D]^T  (x-half of the gate)
    consts_ref: (1, 4, D)       per-batch rows: [attn_b, gate_spk_b, ln_gamma, ln_beta]
    out_ref:    (1, s_tile, D)
    """
    x = x_ref[0].astype(jnp.float32)        # (s_tile, D)
    c = consts_ref[0]                       # (4, D), loaded once
    attn = c[0:1]                           # (1, D) attention output (constant over seq)
    gspk = c[1:2]                           # (1, D) spk-side gate pre-act, incl. gate bias
    gamma = c[2:3]
    beta = c[3:4]

    # Single MXU matmul: x-half of the gate.  The attn-half + all biases were
    # folded into per-batch vectors in the wrapper (KV length == 1 => softmax == 1).
    gate_pre = jnp.dot(x_ref[0].astype(matmul_dtype), wg1T_ref[...],
                       preferred_element_type=jnp.float32) + gspk
    g = jax.nn.sigmoid(gate_pre)

    # g*attn + (1-g)*x  ==  x + g*(attn - x)   (one fewer VPU op per element)
    fused = x + g * (attn - x)

    # LayerNorm over the feature dim (eps = 1e-5, biased variance).
    mean = jnp.mean(fused, axis=-1, keepdims=True)
    var = jnp.mean((fused - mean) ** 2, axis=-1, keepdims=True)
    y = (fused - mean) * jax.lax.rsqrt(var + 1e-5)
    out_ref[0] = (y * gamma + beta).astype(out_ref.dtype)


def _pick_s_tile(B, S, D):
    """Seq-tile length: largest multiple of 8 keeping the double-buffered x/out
    tiles well under v7x's 32 MiB scoped-VMEM default (64 MiB physical), while
    guaranteeing >= 2 grid steps in total so both v7x TensorCores get work.
    No cost on single-TC v5e/v6e."""
    budget_bytes = 16 * 1024 * 1024            # 2x(x tile) + 2x(out tile) budget
    cap = budget_bytes // (16 * max(D, 1))     # s_tile * D * 4B * 4 buffers
    cap = max(8, (cap // 8) * 8)
    s_tile = S if S <= cap else cap
    if B * (-(-S // s_tile)) < 2:              # only one grid step overall
        half = S // 2
        if half >= 8 and half % 8 == 0:
            s_tile = half                      # split seq so v7x can use both TCs
    return s_tile


def gated_cross_attention(speech_features, speaker_embedding, params,
                          *, use_bf16_matmul=False):
    """speech_features: (B, S, D); speaker_embedding: (B, Dk)."""
    B, S, D = speech_features.shape
    assert speaker_embedding.ndim == 2 and speaker_embedding.shape[0] == B, (
        "speaker_embedding must be (B, Dk); the KV-length-1 simplification "
        "relies on the module's unsqueeze(1).")
    f32 = jnp.float32
    hp = jax.lax.Precision.HIGHEST

    # ---- per-batch speaker-side precompute (B rows, tiny) done once in JAX ----
    _, _, bv = jnp.split(params["in_proj_bias"].astype(f32), 3)
    spk = speaker_embedding.astype(f32)
    v = jnp.dot(spk, params["v_proj_weight"].astype(f32).T, precision=hp) + bv
    attn_b = (jnp.dot(v, params["out_proj_weight"].astype(f32).T, precision=hp)
              + params["out_proj_bias"].astype(f32))                               # (B, D)
    wg2T = params["gate_weight"][:, D:].astype(f32).T                              # (D, D)
    gspk_b = jnp.dot(attn_b, wg2T, precision=hp) + params["gate_bias"].astype(f32)  # (B, D)

    matmul_dtype = jnp.bfloat16 if use_bf16_matmul else f32
    wg1T = params["gate_weight"][:, :D].astype(matmul_dtype).T                     # (D, D)

    consts = jnp.stack(
        [attn_b, gspk_b,
         jnp.broadcast_to(params["ln_weight"].astype(f32), (B, D)),
         jnp.broadcast_to(params["ln_bias"].astype(f32), (B, D))],
        axis=1)                                                                    # (B, 4, D)

    s_tile = _pick_s_tile(B, S, D)
    grid = (B, pl.cdiv(S, s_tile))

    cost = pl.CostEstimate(
        flops=2 * B * S * D * D + 12 * B * S * D,
        transcendentals=B * S * D,
        bytes_accessed=(2 * B * S * D * speech_features.dtype.itemsize
                        + D * D * wg1T.dtype.itemsize + 4 * B * D * 4),
    )

    kernel = functools.partial(gated_cross_attn_kernel, matmul_dtype=matmul_dtype)

    # TODO(synk): if the surrounding model permits a lane-dense (multiple-of-128)
    # feature layout, reshape x/out wrapper-side to avoid masked D=64 stores.
    out = pl.pallas_call(
        kernel,
        out_shape=jax.ShapeDtypeStruct((B, S, D), speech_features.dtype),
        grid_spec=pltpu.PrefetchScalarGridSpec(
            num_scalar_prefetch=0,
            grid=grid,
            in_specs=[
                pl.BlockSpec((1, s_tile, D), lambda b, s: (b, s, 0)),
                pl.BlockSpec((D, D), lambda b, s: (0, 0)),
                pl.BlockSpec((1, 4, D), lambda b, s: (b, 0, 0)),
            ],
            out_specs=pl.BlockSpec((1, s_tile, D), lambda b, s: (b, s, 0)),
        ),
        compiler_params=pltpu.CompilerParams(
            dimension_semantics=("parallel", "parallel")),
        cost_estimate=cost,
    )(speech_features, wg1T, consts)

    return out


def reference_forward(x, spk, p, num_heads):
    """Pure-JAX replica of the full PyTorch forward (incl. the trivial softmax)."""
    B, S, D = x.shape
    hd = D // num_heads
    kv = spk[:, None, :]
    bq, bk, bv = jnp.split(p["in_proj_bias"], 3)
    q = x @ p["q_proj_weight"].T + bq
    k = kv @ p["k_proj_weight"].T + bk
    v = kv @ p["v_proj_weight"].T + bv
    qh = q.reshape(B, S, num_heads, hd).transpose(0, 2, 1, 3)
    kh = k.reshape(B, 1, num_heads, hd).transpose(0, 2, 1, 3)
    vh = v.reshape(B, 1, num_heads, hd).transpose(0, 2, 1, 3)
    scores = jnp.einsum("bhqd,bhkd->bhqk", qh, kh) / jnp.sqrt(jnp.float32(hd))
    w = jax.nn.softmax(scores, axis=-1)            # length-1 key axis -> all ones
    ah = jnp.einsum("bhqk,bhkd->bhqd", w, vh)
    a = ah.transpose(0, 2, 1, 3).reshape(B, S, D)
    attn = a @ p["out_proj_weight"].T + p["out_proj_bias"]
    gate_in = jnp.concatenate([x, attn], axis=-1)
    g = jax.nn.sigmoid(gate_in @ p["gate_weight"].T + p["gate_bias"])
    fused = g * attn + (1.0 - g) * x
    mean = fused.mean(-1, keepdims=True)
    var = ((fused - mean) ** 2).mean(-1, keepdims=True)
    return (fused - mean) / jnp.sqrt(var + 1e-5) * p["ln_weight"] + p["ln_bias"]


def make_params(key, speech_dim, speaker_dim):
    D, Dk = speech_dim, speaker_dim
    ks = jax.random.split(key, 8)
    s = 0.1
    return {
        "q_proj_weight": s * jax.random.normal(ks[0], (D, D), jnp.float32),
        "k_proj_weight": s * jax.random.normal(ks[1], (D, Dk), jnp.float32),
        "v_proj_weight": s * jax.random.normal(ks[2], (D, Dk), jnp.float32),
        "in_proj_bias": s * jax.random.normal(ks[3], (3 * D,), jnp.float32),
        "out_proj_weight": s * jax.random.normal(ks[4], (D, D), jnp.float32),
        "out_proj_bias": s * jax.random.normal(ks[5], (D,), jnp.float32),
        "gate_weight": s * jax.random.normal(ks[6], (D, 2 * D), jnp.float32),
        "gate_bias": s * jax.random.normal(ks[7], (D,), jnp.float32),
        "ln_weight": jnp.ones((D,), jnp.float32),
        "ln_bias": jnp.zeros((D,), jnp.float32),
    }


if __name__ == "__main__":
    B, S, SPEECH_DIM, SPEAKER_DIM, NUM_HEADS = 2, 16, 64, 32, 8

    key = jax.random.PRNGKey(0)
    kx, kspk, kp = jax.random.split(key, 3)
    speech = jax.random.normal(kx, (B, S, SPEECH_DIM), jnp.float32)
    speaker = jax.random.normal(kspk, (B, SPEAKER_DIM), jnp.float32)
    params = make_params(kp, SPEECH_DIM, SPEAKER_DIM)

    out = gated_cross_attention(speech, speaker, params)
    out = jax.block_until_ready(out)

    ref = reference_forward(speech, speaker, params, NUM_HEADS)
    # The per-batch speaker-side precompute reassociates a few tiny fp32
    # contractions; 1e-4 is far below any real-bug signal.
    np.testing.assert_allclose(np.asarray(out), np.asarray(ref), rtol=1e-4, atol=1e-4)

    print("KERNEL_OK")
</pallas_src>

<mosaic_0001>
module attributes {stable_mosaic.version = 11 : i64} {
  func.func @gated_cross_attn_kernel(%arg0: i32, %arg1: i32, %arg2: memref<1x16x64xf32, #tpu.memory_space<vmem>>, %arg3: memref<64x64xf32, #tpu.memory_space<vmem>>, %arg4: memref<1x4x64xf32, #tpu.memory_space<vmem>>, %arg5: memref<1x16x64xf32, #tpu.memory_space<vmem>>) attributes {dimension_semantics = [#tpu.dimension_semantics<parallel>, #tpu.dimension_semantics<parallel>], iteration_bounds = array<i64: 2, 1>, scalar_prefetch = 0 : i64, scratch_operands = 0 : i64, tpu.core_type = #tpu.core_type<tc>, window_params = [{transform_indices = @transform_0, window_bounds = array<i64: 1, 16, 64>}, {pipeline_mode = #tpu.pipeline_mode<synchronous>, transform_indices = @transform_1, window_bounds = array<i64: 64, 64>}, {transform_indices = @transform_2, window_bounds = array<i64: 1, 4, 64>}, {transform_indices = @transform_3, window_bounds = array<i64: 1, 16, 64>}]} {
    %c0 = arith.constant 0 : index
    %c0_0 = arith.constant 0 : index
    %c0_1 = arith.constant 0 : index
    %0 = vector.load %arg2[%c0, %c0_0, %c0_1] : memref<1x16x64xf32, #tpu.memory_space<vmem>>, vector<1x16x64xf32>
    %1 = vector.shape_cast %0 : vector<1x16x64xf32> to vector<16x64xf32>
    %c0_2 = arith.constant 0 : index
    %c0_3 = arith.constant 0 : index
    %c0_4 = arith.constant 0 : index
    %2 = vector.load %arg4[%c0_2, %c0_3, %c0_4] : memref<1x4x64xf32, #tpu.memory_space<vmem>>, vector<1x4x64xf32>
    %3 = vector.shape_cast %2 : vector<1x4x64xf32> to vector<4x64xf32>
    %4 = vector.extract_strided_slice %3 {offsets = [0, 0], sizes = [1, 64], strides = [1, 1]} : vector<4x64xf32> to vector<1x64xf32>
    %5 = vector.extract_strided_slice %3 {offsets = [1, 0], sizes = [1, 64], strides = [1, 1]} : vector<4x64xf32> to vector<1x64xf32>
    %6 = vector.extract_strided_slice %3 {offsets = [2, 0], sizes = [1, 64], strides = [1, 1]} : vector<4x64xf32> to vector<1x64xf32>
    %7 = vector.extract_strided_slice %3 {offsets = [3, 0], sizes = [1, 64], strides = [1, 1]} : vector<4x64xf32> to vector<1x64xf32>
    %c0_5 = arith.constant 0 : index
    %c0_6 = arith.constant 0 : index
    %c0_7 = arith.constant 0 : index
    %8 = vector.load %arg2[%c0_5, %c0_6, %c0_7] : memref<1x16x64xf32, #tpu.memory_space<vmem>>, vector<1x16x64xf32>
    %9 = vector.shape_cast %8 : vector<1x16x64xf32> to vector<16x64xf32>
    %c0_8 = arith.constant 0 : index
    %c0_9 = arith.constant 0 : index
    %10 = vector.load %arg3[%c0_8, %c0_9] : memref<64x64xf32, #tpu.memory_space<vmem>>, vector<64x64xf32>
    %cst = arith.constant dense<0.000000e+00> : vector<16x64xf32>
    %11 = tpu.matmul %9, %10, %cst {dimension_numbers = #tpu.dot_dimension_numbers<[1], [0], [0], [1], [0, 0, 1, 1], [], []>} : vector<16x64xf32>, vector<64x64xf32>, vector<16x64xf32> -> vector<16x64xf32>
    %12 = vector.broadcast %5 : vector<1x64xf32> to vector<16x64xf32>
    %13 = arith.addf %11, %12 : vector<16x64xf32>
    %14 = arith.negf %13 : vector<16x64xf32>
    %15 = math.exp %14 : vector<16x64xf32>
    %cst_10 = arith.constant 1.000000e+00 : f32
    %16 = vector.broadcast %cst_10 : f32 to vector<16x64xf32>
    %17 = arith.addf %16, %15 : vector<16x64xf32>
    %18 = arith.divf %16, %17 : vector<16x64xf32>
    %19 = vector.broadcast %4 : vector<1x64xf32> to vector<16x64xf32>
    %20 = arith.subf %19, %1 : vector<16x64xf32>
    %21 = arith.mulf %18, %20 : vector<16x64xf32>
    %22 = arith.addf %1, %21 : vector<16x64xf32>
    %cst_11 = arith.constant dense<0.000000e+00> : vector<16xf32>
    %23 = vector.multi_reduction <add>, %22, %cst_11 [1] : vector<16x64xf32> to vector<16xf32>
    %24 = vector.shape_cast %23 : vector<16xf32> to vector<16x1xf32>
    %cst_12 = arith.constant 6.400000e+01 : f32
    %25 = vector.broadcast %cst_12 : f32 to vector<16x1xf32>
    %26 = arith.divf %24, %25 : vector<16x1xf32>
    %27 = vector.broadcast %26 : vector<16x1xf32> to vector<16x64xf32>
    %28 = arith.subf %22, %27 : vector<16x64xf32>
    %29 = arith.mulf %28, %28 : vector<16x64xf32>
    %cst_13 = arith.constant dense<0.000000e+00> : vector<16xf32>
    %30 = vector.multi_reduction <add>, %29, %cst_13 [1] : vector<16x64xf32> to vector<16xf32>
    %31 = vector.shape_cast %30 : vector<16xf32> to vector<16x1xf32>
    %cst_14 = arith.constant 6.400000e+01 : f32
    %32 = vector.broadcast %cst_14 : f32 to vector<16x1xf32>
    %33 = arith.divf %31, %32 : vector<16x1xf32>
    %34 = vector.broadcast %26 : vector<16x1xf32> to vector<16x64xf32>
    %35 = arith.subf %22, %34 : vector<16x64xf32>
    %cst_15 = arith.constant 9.99999974E-6 : f32
    %36 = vector.broadcast %cst_15 : f32 to vector<16x1xf32>
    %37 = arith.addf %33, %36 : vector<16x1xf32>
    %38 = math.rsqrt %37 : vector<16x1xf32>
    %39 = vector.broadcast %38 : vector<16x1xf32> to vector<16x64xf32>
    %40 = arith.mulf %35, %39 : vector<16x64xf32>
    %41 = vector.broadcast %6 : vector<1x64xf32> to vector<16x64xf32>
    %42 = arith.mulf %40, %41 : vector<16x64xf32>
    %43 = vector.broadcast %7 : vector<1x64xf32> to vector<16x64xf32>
    %44 = arith.addf %42, %43 : vector<16x64xf32>
    %c0_16 = arith.constant 0 : index
    %c0_17 = arith.constant 0 : index
    %c0_18 = arith.constant 0 : index
    %45 = vector.load %arg5[%c0_16, %c0_17, %c0_18] : memref<1x16x64xf32, #tpu.memory_space<vmem>>, vector<1x16x64xf32>
    %46 = vector.shape_cast %45 : vector<1x16x64xf32> to vector<16x64xf32>
    %47 = vector.shape_cast %44 : vector<16x64xf32> to vector<1x16x64xf32>
    tpu.vector_store %arg5[%c0_16, %c0_17, %c0_18], %47 {strides = array<i32>} : memref<1x16x64xf32, #tpu.memory_space<vmem>>, vector<1x16x64xf32>,
    return
  }
  func.func @transform_0(%arg0: i32, %arg1: i32) -> (i32, i32, i32) {
    %c0_i32 = arith.constant 0 : i32
    %c0_i32_0 = arith.constant 0 : i32
    return %arg0, %arg1, %c0_i32 : i32, i32, i32
  }
  func.func @transform_1(%arg0: i32, %arg1: i32) -> (i32, i32) {
    %c0_i32 = arith.constant 0 : i32
    %c0_i32_0 = arith.constant 0 : i32
    %c0_i32_1 = arith.constant 0 : i32
    return %c0_i32, %c0_i32_0 : i32, i32
  }
  func.func @transform_2(%arg0: i32, %arg1: i32) -> (i32, i32, i32) {
    %c0_i32 = arith.constant 0 : i32
    %c0_i32_0 = arith.constant 0 : i32
    %c0_i32_1 = arith.constant 0 : i32
    return %arg0, %c0_i32, %c0_i32_0 : i32, i32, i32
  }
  func.func @transform_3(%arg0: i32, %arg1: i32) -> (i32, i32, i32) {
    %c0_i32 = arith.constant 0 : i32
    %c0_i32_0 = arith.constant 0 : i32
    return %arg0, %arg1, %c0_i32 : i32, i32, i32
  }
}

</mosaic_0001>

<bundles_post_ra>
// kernel: tpu_custom_call.1
= control target key start
LH: loop header
LB: loop body
LE: loop exit
PB: predicated region body
PF: predicated region fallthrough
CT: control target
= control target key end

     0   :  { %s1086_s0 = inlined_call_operand.hbm [shape: f32[2,16,64], index: 0, kind: input, shape index: {}]   ;;  %s1087_s1 = inlined_call_operand.hbm [shape: f32[64,64], index: 1, kind: input, shape index: {}]   ;;  %s1088_s2 = inlined_call_operand.hbm [shape: f32[2,4,64], index: 2, kind: input, shape index: {}]   ;;  %s1089_s3 = inlined_call_operand.hbm [shape: f32[2,16,64], index: 3, kind: output, shape index: {}]  }
   0x1   :  { %1092 = sst [smem:[#allocation13_spill]] %s1086_s0 }
   0x2   :  { %1093 = sst [smem:[#allocation14_spill]] %s1087_s1 }
   0x3   :  { %8 = vsyncpa [#allocation3], 0 }
   0x4   :  { %10 = vsyncpa [#allocation3 + $0x1], 0 }
   0x5   :  { %11 = vsyncpa [#allocation6], 0 }
   0x6   :  { %12 = vsyncpa [#allocation4], 0 }
   0x7   :  { %14 = vsyncpa [#allocation4 + $0x1], 0  ;;  %s884_s12 = smov 0   ;;  %s886_s13 = smov 0  }
   0x8   :  { %s888_s14 = smov 0   ;;  %s890_s15 = smov 0  }
   0x9   :  { %s892_s16 = smov 0   ;;  %s894_s17 = smov 0  }
   0xa LB: > { %s32_s18 = sadd.s32 1, %s852_s16  ;;  %s41_s19 = sadd.s32 1, %s844_s14  ;;  %s856_s17 = sphi %s894_s17, %s20_s17   ;;  %s852_s16 = sphi %s892_s16, %s1108_s16   ;;  %s848_s15 = sphi %s890_s15, %s1107_s15   ;;  %s844_s14 = sphi %s888_s14, %s1106_s14   ;;  %s840_s13 = sphi %s886_s13, %s1105_s13   ;;  %s836_s12 = sphi %s884_s12, %s1104_s12  }
   0xb   : > { %p34_p0 = scmp.ge.s32.totalorder %s32_s18, 2  ;;  %p48_p1 = scmp.ne.s32.totalorder %s844_s14, %s840_s13 }
   0xc   : > { %p49_p2 = scmp.eq.s32.totalorder %s856_s17, 0  ;;  %p549_p4 = scmp.ge.s32.totalorder %s856_s17, 2 }
   0xd   : > { %s1110_s18 = smov (%p34_p0, %s32_s18), 0  ;;  %p605_p6 = scmp.lt.s32.totalorder %s856_s17, 2 }
   0xe   : > { %p924_p3 = por %p49_p2, %p48_p1  ;;  %s36_s21 = ssub.s32 %s852_s16, %s1110_s18 }
   0xf   : > { %p39_p5 = scmp.eq.s32.totalorder %s36_s21, 0  ;;  %s167_s22 = sand.u32 1, %s856_s17  }
  0x10   : > { %s169_s23 = sand.u32 1, %s844_s14   ;;  %s569_s26 = sshll.u32 %s852_s16, 4 }
  0x11   : > { %s935_s24 = scalar_select %p39_p5, %s844_s14, %s41_s19  }
  0x12   : > { %s550_s25 = sshll.u32 %s169_s23, 4  ;;  %s1095_s0 = sld [smem:[#allocation13_spill]] }
  0x13   : > { %s171_s30 = scalar_lea.vmem [#allocation2], %s550_s25  ;;  %p943_p7 = pnand %p605_p6, %p924_p3 }
  0x14   : > { %s181_s4 = sshll.u32 %s171_s30, 4  ;;  %s947_s7 = scalar_lea.sflag [#allocation3], %s167_s22  ;;  %s182_s4 = int_to_ptr.vmem [resolvable:$true] %s181_s4 }
  0x15   : > { %s1090_s8 = smov 128   ;;  %s1091_s9 = smov 8  }
  0x16   : > { %s956_s10 = sadd.s32 4294967295, %s856_s17   ;;  %s546_s11 = sadd.s32 4294967294, %s856_s17  }
  0x17   : > { %p54_p8 = scmp.ne.s32.totalorder %s840_s13, %s836_s12  ;;  %p55_p9 = scmp.eq.s32.totalorder %s956_s10, 0 }
  0x18   : > { %s178_s29 = scalar_lea.hbm %s1095_s0, %s569_s26  ;;  %p127_p10 = scmp.eq.s32.totalorder %s956_s10, 1 }
  0x19   : > { %s179_s5 = sshll.u32 %s178_s29, 4  ;;  %p133_p11 = scmp.eq.s32.totalorder %s546_s11, 1  ;;  %s180_s5 = int_to_ptr.hbm [resolvable:$true] %s179_s5 }
  0x1a   : > { %596 = dma.hbm_to_vmem [thread:$0]  (!%p943_p7), %s180_s5, 256, %s182_s4, %s947_s7, %s1090_s8, %s1090_s8, %s1091_s9  }
  0x1b   : > { %p547_p12 = scmp.ge.s32.totalorder %s856_s17, 1  ;;  %p966_p13 = por %p55_p9, %p54_p8 }
  0x1c   : > { %p973_p0 = por %p127_p10, %p48_p1  ;;  %p977_p2 = por %p133_p11, %p54_p8 }
  0x1d   : > { %p140_p3 = scmp.lt.s32.totalorder %s856_s17, 3  ;;  %s1100_s1 = sld [smem:[#allocation14_spill]] }
  0x1e   : > { %s553_s28 = sshll.u32 %s169_s23, 2  ;;  %s860_s29 = smov [#allocation5]  }
  0x1f   : > { %p985_p5 = pnand %p547_p12, %p140_p3  ;;  %s153_s30 = sshll.u32 %s860_s29, 4  ;;  %s154_s30 = int_to_ptr.vmem [resolvable:$true] %s153_s30 }
  0x20   : > { %s554_s4 = sshll.u32 %s852_s16, 2  ;;  %s195_s25 = scalar_lea.vmem [#allocation7], %s553_s28 }
  0x21   : > { %p589_p1 = pneg %p985_p5  ;;  %s199_s22 = scalar_lea.hbm %s1088_s2, %s554_s4 }
  0x22   : > { %s203_s8 = sshll.u32 %s195_s25, 4  ;;  %s201_s9 = sshll.u32 %s199_s22, 4  ;;  %s202_s9 = int_to_ptr.hbm [resolvable:$true] %s201_s9  ;;  %s204_s8 = int_to_ptr.vmem [resolvable:$true] %s203_s8 }
  0x23   : > { %s151_s26 = sshll.u32 %s1100_s1, 4  ;;  %p590_p6 = pnand %p589_p1, %p55_p9  ;;  %s152_s26 = int_to_ptr.hbm [resolvable:$true] %s151_s26 }
  0x24   : > { %s1102_s0 = smov 8   ;;  %s1103_s1 = smov 128  }
  0x25   : > { %592 = dma.hbm_to_vmem [thread:$0]  (!%p590_p6), %s152_s26, 1024, %s154_s30, [#allocation6], %s1103_s1, %s1103_s1, %s1102_s0  }
  0x26   : > { %599 = dma.hbm_to_vmem [thread:$0]  (!%p943_p7), %s202_s9, 64, %s204_s8, %s947_s7  }
  0x27   : > { %212 = sbr.rel (%p985_p5) target bundleno = 506 (0x1fa), region = 32  ;;  %s214_s23 = sand.u32 (!%p985_p5), 1, %s956_s10  }
  0x28   : > { %s1007_s29 = sand.u32 (!%p985_p5), 1, %s840_s13   ;;  %s215_s4 = scalar_lea.sflag (!%p985_p5), [#allocation3], %s214_s23 }
  0x29   : > { %s556_s28 = sshll.u32 (!%p985_p5), %s1007_s29, 4 }
  0x2a   : > { %s1012_s5 = scalar_lea.vmem (!%p985_p5), [#allocation2], %s556_s28 }
  0x2c   : > { %819 = dma.done.wait (%p966_p13), %s215_s4, 256  }
  0x2d   : > { %821 = vsyncadd (%p966_p13), %s215_s4, 4294967040 }
  0x2e   : > { %823 = dma.done.wait (%p55_p9), [#allocation6], 1024  }
  0x2f   : > { %825 = vsyncadd (%p55_p9), [#allocation6], 4294966272  ;;  %s558_s0 = sshll.u32 %s1007_s29, 2 }
  0x30   : > { %s1023_s1 = scalar_lea.vmem [#allocation7], %s558_s0 }
  0x31   : > { %827 = dma.done.wait (%p966_p13), %s215_s4, 64  }
  0x32   : > { %829 = vsyncadd (%p966_p13), %s215_s4, 4294967232  ;;  %v274_v0 = vld [vmem:[#allocation5 + $0x38] sm:$0xff]  ;;  %v273_v1 = vld [vmem:[#allocation5 + $0x30] sm:$0xff]  ;;  %vm276_vm0 = vcmask 523264   ;;  %v861_v51 = vmov 64.0   ;;  %s570_s6 = sshll.u32 %s848_s15, 4 }
  0x33   : > { %291 = vmatpush.msra.mxu0 %v274_v0  ;;  %571 = vmatpush.msra.mxu1 %v274_v0  ;;  %v272_v2 = vld [vmem:[#allocation5 + $0x28] sm:$0xff]  ;;  %v271_v3 = vld [vmem:[#allocation5 + $0x20] sm:$0xff]  ;;  %v270_v4 = vld [vmem:[#allocation5 + $0x18] sm:$0xff]  ;;  %s424_s9 = scalar_lea.hbm %s1089_s3, %s570_s6  ;;  %s261_s10 = scalar_lea.vmem [#allocation8], %s556_s28 }
  0x34   : > { %v269_v5 = vld [vmem:[#allocation5 + $0x10] sm:$0xff]  ;;  %v268_v6 = vld [vmem:[#allocation5 + $0x8] sm:$0xff]  ;;  %v267_v7 = vld [vmem:[#allocation5] sm:$0xff]  ;;  %s425_s19 = sshll.u32 %s261_s10, 4  ;;  %s427_s15 = sshll.u32 %s424_s9, 4  ;;  %s426_s19 = int_to_ptr.vmem [resolvable:$true] %s425_s19  ;;  %s428_s15 = int_to_ptr.hbm [resolvable:$true] %s427_s15 }
  0x35   : > { %292 = vmatpush.msra.mxu0 %v273_v1  ;;  %572 = vmatpush.msra.mxu1 %v273_v1  ;;  %v264_v8 = vld [vmem:[%s1012_s5] sm:$0xff]  ;;  %v265_v9 = vld [vmem:[%s1012_s5 + $0x8] sm:$0xff]  ;;  %s411_s26 = scalar_lea.sflag [#allocation4], %s1007_s29  ;;  %s780_s27 = sshra.s32 %s428_s15, 4  ;;  %s781_s27 = int_to_ptr.hbm [resolvable:$true] %s780_s27 }
  0x36   : > { %v1034_v10 = vld [vmem:[%s1023_s1] sm:$0xf]  ;;  %s782_s30 = scalar_lea.hbm %s781_s27, 16  ;;  %s786_s25 = scalar_lea.hbm %s1089_s3, 32 }
  0x37   : > { %293 = vmatpush.msra.mxu0 %v272_v2  ;;  %573 = vmatpush.msra.mxu1 %v272_v2  ;;  %v275_v11 = vperm.slane %v1034_v10, 1  ;;  %v344_v26 = vperm.slane %v1034_v10, 0  ;;  %p783_p7 = scmp.ne.s32.totalorder %s781_s27, %s782_s30  ;;  %p787_p10 = scmp.lt.s32.totalorder %s781_s27, %s1089_s3 }
  0x38   : > { %p788_p11 = scmp.lt.s32.totalorder %s786_s25, %s782_s30 }
  0x39   : > { %294 = vmatpush.msra.mxu0 %v271_v3  ;;  %574 = vmatpush.msra.mxu1 %v271_v3  ;;  %v345_v34 = vsub.f32 %v344_v26, %v264_v8  ;;  %v346_v43 = vsub.f32 %v344_v26, %v265_v9  ;;  %p784_p8 = pnand %p783_p7, %p973_p0 }
  0x3a   : > { %p789_p12 = por %p788_p11, %p787_p10 }
  0x3b   : > { %295 = vmatpush.msra.mxu0 %v270_v4  ;;  %575 = vmatpush.msra.mxu1 %v270_v4  ;;  %p785_p9 = pneg %p784_p8 }
  0x3d   : > { %296 = vmatpush.msra.mxu0 %v269_v5  ;;  %576 = vmatpush.msra.mxu1 %v269_v5  ;;  %p790_p13 = pnand %p789_p12, %p785_p9 }
  0x3f   : > { %297 = vmatpush.msra.mxu0 %v268_v6  ;;  %577 = vmatpush.msra.mxu1 %v268_v6 }
  0x41   : > { %298 = vmatpush.msra.mxu0 %v267_v7  ;;  %578 = vmatpush.msra.mxu1 %v267_v7 }
  0x42   : > { %560 = vmatmul.msk.f32.vlgmr.msra.gmra.mxu0 %vm276_vm0, %v264_v8  ;;  %561 = vmatmul.msk.f32.vlgmr.msra.gmra.mxu1 %vm276_vm0, %v265_v9 }
  0xbf   : > { %v300_v12 = vpop.f32.mrf.mxu0  ;;  %v303_v13 = vpop.f32.mrf.mxu1 }
  0xc0   : > { %v301_v14 = vadd.f32 %v300_v12, %v275_v11  ;;  %v304_v15 = vadd.f32 %v303_v13, %v275_v11 }
  0xc2   : > { %v562_v16 = vmul.f32 -1.442695, %v301_v14  ;;  %v563_v17 = vmul.f32 -1.442695, %v304_v15 }
  0xc4   : > { %662 = vpow2.f32 %v562_v16 }
  0xc5   : > { %664 = vpow2.f32 %v563_v17 }
  0xca   : > { %v663_v18 = vpop.eup %662 }
  0xcb   : > { %v665_v19 = vpop.eup %664  ;;  %v312_v20 = vadd.f32 1.0, %v663_v18 }
  0xcc   : > { %v313_v21 = vadd.f32 1.0, %v665_v19  ;;  %v402_v19 = vperm.slane %v1034_v10, 2 }
  0xcd   : > { %666 = vrcp.f32 %v312_v20  ;;  %v325_v28 = vand.u32 2147483648, %v312_v20  ;;  %v323_v31 = vand.u32 2147483647, %v312_v20  ;;  %vm319_vm4 = vweird.f32 %v312_v20 }
  0xce   : > { %668 = vrcp.f32 %v313_v21  ;;  %vm334_vm2 = vweird.f32 %v313_v21  ;;  %v340_v33 = vand.u32 2147483648, %v313_v21  ;;  %v338_v36 = vand.u32 2147483647, %v313_v21 }
  0xcf   : > { %v326_v37 = vor.u32 1.1754944e-38, %v325_v28  ;;  %vm324_vm6 = vcmp.eq.f32.partialorder %v323_v31, 8.507059e+37  ;;  %670 = vrcp.f32 %v861_v51 }
  0xd0   : > { %v341_v42 = vor.u32 1.1754944e-38, %v340_v33  ;;  %vm339_vm8 = vcmp.eq.f32.partialorder %v338_v36, 8.507059e+37 }
  0xd3   : > { %v667_v22 = vpop.eup %666 }
  0xd4   : > { %v669_v23 = vpop.eup %668  ;;  %v315_v24 = vmul.f32 %v667_v22, %v312_v20  ;;  %vm320_vm1 = vweird.f32 %v667_v22 }
  0xd5   : > { %v330_v25 = vmul.f32 %v669_v23, %v313_v21  ;;  %vm335_vm3 = vweird.f32 %v669_v23  ;;  %vm321_vm5 = vmor %vm319_vm4, %vm320_vm1  ;;  %v671_v52 = vpop.eup %670 }
  0xd6   : > { %v316_v27 = vsub.f32 1.0, %v315_v24  ;;  %vm336_vm7 = vmor %vm334_vm2, %vm335_vm3  ;;  %v358_v53 = vmul.f32 64.0, %v671_v52  ;;  %vm362_vm9 = vweird.f32 %v671_v52 }
  0xd7   : > { %v331_v29 = vsub.f32 1.0, %v330_v25 }
  0xd8   : > { %v317_v30 = vmul.f32 %v667_v22, %v316_v27  ;;  %v359_v54 = vsub.f32 1.0, %v358_v53 }
  0xd9   : > { %v332_v32 = vmul.f32 %v669_v23, %v331_v29 }
  0xda   : > { %v318_v35 = vadd.f32 %v667_v22, %v317_v30  ;;  %v360_v55 = vmul.f32 %v671_v52, %v359_v54 }
  0xdb   : > { %v333_v38 = vadd.f32 %v669_v23, %v332_v32 }
  0xdc   : > { %v322_v39 = vsel %vm321_vm5, %v667_v22, %v318_v35  ;;  %v361_v56 = vadd.f32 %v671_v52, %v360_v55  ;;  %v405_v22 = vperm.slane %v1034_v10, 3 }
  0xdd   : > { %v327_v40 = vsel %vm324_vm6, %v326_v37, %v322_v39  ;;  %v337_v41 = vsel %vm336_vm7, %v669_v23, %v333_v38 }
  0xde   : > { %v347_v44 = vmul.f32 %v345_v34, %v327_v40  ;;  %v342_v45 = vsel %vm339_vm8, %v341_v42, %v337_v41  ;;  %v363_v57 = vsel %vm362_vm9, %v671_v52, %v361_v56 }
  0xdf   : > { %v348_v48 = vmul.f32 %v346_v43, %v342_v45 }
  0xe0   : > { %v349_v46 = vadd.f32 %v347_v44, %v264_v8 }
  0xe1   : > { %v350_v49 = vadd.f32 %v348_v48, %v265_v9 }
  0xe2   : > { %v351_v47 = vsel %vm276_vm0, %v349_v46, 0.0 }
  0xe3   : > { %352 = vadd.xlane.f32.xlu0 %v351_v47  ;;  %v354_v50 = vsel %vm276_vm0, %v350_v49, 0.0 }
  0xeb   : > { %355 = vadd.xlane.f32.xlu0 %v354_v50 }
 0x156   : > { %v353_v58 = vpop.xlane.xlu0 %352 }
 0x157   : > { %v364_v59 = vmul.f32 %v363_v57, %v353_v58 }
 0x159   : > { %v366_v60 = vsub.f32 %v349_v46, %v364_v59 }
 0x15b   : > { %v368_v61 = vmul.f32 %v366_v60, %v366_v60 }
 0x15d   : > { %v370_v62 = vsel %vm276_vm0, %v368_v61, 0.0 }
 0x15e   : > { %371 = vadd.xlane.f32.xlu1 %v370_v62  ;;  %v356_v63 = vpop.xlane.xlu0 %355 }
 0x15f   : > { %v365_v0 = vmul.f32 %v363_v57, %v356_v63 }
 0x161   : > { %v367_v1 = vsub.f32 %v350_v49, %v365_v0 }
 0x163   : > { %v369_v2 = vmul.f32 %v367_v1, %v367_v1 }
 0x165   : > { %v373_v3 = vsel %vm276_vm0, %v369_v2, 0.0 }
 0x166   : > { %374 = vadd.xlane.f32.xlu1 %v373_v3 }
 0x1d1   : > { %v372_v4 = vpop.xlane.xlu1 %371 }
 0x1d2   : > { %v376_v5 = vmul.f32 %v372_v4, %v363_v57 }
 0x1d4   : > { %v378_v6 = vadd.f32 1e-05, %v376_v5 }
 0x1d6   : > { %672 = vrsqrt.f32 %v378_v6  ;;  %vm386_vm11 = vweird.f32 %v378_v6 }
 0x1d9   : > { %v375_v7 = vpop.xlane.xlu1 %374 }
 0x1da   : > { %v377_v8 = vmul.f32 %v375_v7, %v363_v57 }
 0x1dc   : > { %v673_v9 = vpop.eup %672  ;;  %v379_v11 = vadd.f32 1e-05, %v377_v8 }
 0x1dd   : > { %v381_v12 = vmul.f32 %v673_v9, %v378_v6  ;;  %vm387_vm10 = vweird.f32 %v673_v9 }
 0x1de   : > { %674 = vrsqrt.f32 %v379_v11  ;;  %vm388_vm12 = vmor %vm386_vm11, %vm387_vm10  ;;  %vm396_vm14 = vweird.f32 %v379_v11 }
 0x1df   : > { %v382_v13 = vmul.f32 %v673_v9, %v381_v12 }
 0x1e1   : > { %v383_v14 = vmul.f32 0.5, %v382_v13 }
 0x1e3   : > { %v384_v15 = vsub.f32 1.5, %v383_v14 }
 0x1e4   : > { %v675_v16 = vpop.eup %674 }
 0x1e5   : > { %v385_v17 = vmul.f32 %v673_v9, %v384_v15  ;;  %v391_v18 = vmul.f32 %v675_v16, %v379_v11  ;;  %vm397_vm13 = vweird.f32 %v675_v16 }
 0x1e6   : > { %vm398_vm15 = vmor %vm396_vm14, %vm397_vm13 }
 0x1e7   : > { %v389_v20 = vsel %vm388_vm12, %v673_v9, %v385_v17  ;;  %v392_v21 = vmul.f32 %v675_v16, %v391_v18 }
 0x1e8   : > { %v400_v23 = vmul.f32 %v389_v20, %v366_v60 }
 0x1e9   : > { %v393_v24 = vmul.f32 0.5, %v392_v21 }
 0x1ea   : > { %v403_v25 = vmul.f32 %v402_v19, %v400_v23 }
 0x1eb   : > { %v394_v26 = vsub.f32 1.5, %v393_v24 }
 0x1ec   : > { %v406_v27 = vadd.f32 %v405_v22, %v403_v25 }
 0x1ed   : > { %v395_v28 = vmul.f32 %v675_v16, %v394_v26 }
 0x1ee   : > { %408 = vst.msk [vmem:[%s261_s10] sm:$0xff] %vm276_vm0, %v406_v27 }
 0x1ef   : > { %v399_v10 = vsel %vm398_vm15, %v675_v16, %v395_v28 }
 0x1f0   : > { %v401_v29 = vmul.f32 %v399_v10, %v367_v1 }
 0x1f2   : > { %v404_v30 = vmul.f32 %v402_v19, %v401_v29 }
 0x1f4   : > { %v407_v31 = vadd.f32 %v405_v22, %v404_v30 }
 0x1f6   : > { %409 = vst.msk [vmem:[%s261_s10 + $0x8] sm:$0xff] %vm276_vm0, %v407_v31 }
 0x1f7   : > { %793 = shalt.err (!%p790_p13)
}
 0x1f8   : > { %s862_s29 = smov 128   ;;  %s863_s4 = smov 8  }
 0x1f9   : > { %587 = dma.vmem_to_hbm [thread:$0]  (%p973_p0), %s426_s19, 256, %s428_s15, %s411_s26, %s862_s29, %s862_s29, %s863_s4  }
 0x1fa PF: > { %s442_s5 = sand.u32 1, %s836_s12   ;;  %p601_p3 = pnand %p549_p4, %p977_p2 }
 0x1fb   : > { %s443_s0 = scalar_lea.sflag [#allocation4], %s442_s5 }
 0x1fc   : > { %p602_p5 = pneg %p601_p3 }
 0x1fe   : > { %831 = dma.done.wait (%p602_p5), %s443_s0, 256  }
 0x1ff   : > { %833 = vsyncadd (%p602_p5), %s443_s0, 4294967040  ;;  %s20_s17 = sadd.s32 1, %s856_s17   ;;  %s1104_s12 = smov %s840_s13 }
 0x200   : > { %p17_p1 = scmp.ge.s32.totalorder %s20_s17, 4   ;;  %s1105_s13 = smov %s844_s14 }
 0x201   : > { %s1106_s14 = smov %s935_s24  ;;  %s1107_s15 = smov %s852_s16 }
 0x202   : > { %s1108_s16 = smov %s1110_s18  ;;  %19 = sbr.rel (!%p17_p1) target bundleno = 10 (0xa), region = 92 }
 0x207   :  { %449 = vsyncpa [#allocation3], 1 }
 0x208   :  { %451 = vsyncpa [#allocation3 + $0x1], 1 }
 0x209   :  { %452 = vsyncpa [#allocation6], 1 }
 0x20a   :  { %453 = vsyncpa [#allocation4], 1 }
 0x20b   :  { %455 = vsyncpa [#allocation4 + $0x1], 1 }

</bundles_post_ra>
